<compile_context>
chip_gen: v7x
topology: tpu7x:2x2x1
jax: 0.10.0
libtpu: 0.0.40
codegen_flags: <defaults>
</compile_context>

<pallas_src>
import jax
import jax.numpy as jnp
from jax.experimental import pallas as pl
from jax.experimental.pallas import tpu as pltpu


# ---------------------------------------------------------------------------
# Pallas kernels
# ---------------------------------------------------------------------------
def _xcorr_kernel(x_ref, w_ref, o_ref):
    """One row-tile of the batched cross-correlation.

    x_ref: (rt, N)    rows of xsub^T for a slice of images (rt = tile of B*d rows)
    w_ref: (N, P*d)   all prototypes, flattened, VMEM-resident (constant index_map)
    o_ref: (rt, P*d)  lane-dense output slab
    """
    o_ref[...] = jnp.dot(x_ref[...], w_ref[...],
                         preferred_element_type=jnp.float32).astype(o_ref.dtype)


def _weighted_sq_dist_kernel(theta_ref, r_ref, o_ref):
    """Relevance-weighted geodesic distance for the whole batch in one step.

    theta_ref: (B, P, d) principal angles arccos(S)
    r_ref    : (1, d)    relevances
    o_ref    : (B, P, 1) distances (squaring fused in-kernel)
    """
    theta = theta_ref[...]
    r = r_ref[...]                                   # (1, d) -> broadcast (1, 1, d)
    o_ref[...] = jnp.sum(theta * theta * r[None], axis=-1, keepdims=True)


# ---------------------------------------------------------------------------
# Pallas wrappers
# ---------------------------------------------------------------------------
def _pick_row_tile(rows):
    """Largest MXU-friendly row tile (multiple of 8) dividing `rows`, else full extent."""
    for t in (512, 256, 128, 64, 32, 16, 8):
        if rows % t == 0:
            return t
    return rows                                      # equals-full-dim rule for tiny batches


def cross_correlation_pallas(xrows, w_flat):
    """(B*d, N) @ (N, P*d) -> (B*d, P*d), lane-dense, prototypes resident in VMEM.

    xrows : (B*d, N)  transposed Grassmann bases, images packed along rows
    w_flat: (N, P*d)  prototypes pre-flattened once at init (static parameters)
    """
    R, N = xrows.shape
    N2, PD = w_flat.shape
    assert N == N2, (xrows.shape, w_flat.shape)

    rt = _pick_row_tile(R)
    grid = (R // rt,)

    cost = pl.CostEstimate(
        flops=2 * R * N * PD,
        transcendentals=0,
        bytes_accessed=4 * (R * N + N * PD + R * PD),
    )

    return pl.pallas_call(
        _xcorr_kernel,
        out_shape=jax.ShapeDtypeStruct((R, PD), jnp.float32),
        grid=grid,
        in_specs=[
            # Row tile of the packed bases.
            pl.BlockSpec((rt, N), lambda i: (i, 0)),
            # All prototypes, constant index_map -> fetched once, stays VMEM-resident.
            pl.BlockSpec((N, PD), lambda i: (0, 0)),
        ],
        out_specs=pl.BlockSpec((rt, PD), lambda i: (i, 0)),
        compiler_params=pltpu.CompilerParams(
            dimension_semantics=("parallel",)),
        cost_estimate=cost,
    )(xrows.astype(jnp.float32), w_flat.astype(jnp.float32))


def weighted_geodesic_distance_pallas(theta, relevances):
    """distance[b, p] = sum_k relevances[0, k] * theta[b, p, k]^2  ->  (B, P).

    Single grid step over the whole batch (tiny reduction; avoids per-image launches).
    """
    B, P, d = theta.shape
    out = pl.pallas_call(
        _weighted_sq_dist_kernel,
        out_shape=jax.ShapeDtypeStruct((B, P, 1), jnp.float32),
        grid=(1,),
        in_specs=[
            pl.BlockSpec((B, P, d), lambda i: (0, 0, 0)),
            pl.BlockSpec((1, d), lambda i: (0, 0)),
        ],
        out_specs=pl.BlockSpec((B, P, 1), lambda i: (0, 0, 0)),
    )(theta.astype(jnp.float32), relevances.astype(jnp.float32))
    return out[..., 0]


# ---------------------------------------------------------------------------
# Plain-JAX glue (parameter setup, SVDs)
# ---------------------------------------------------------------------------
def grassmann_repr_t(batch_imgs, dim_of_subspace):
    """(B, C, H, W) NCHW -> xsub^T of shape (B, dim_of_subspace, H*W).

    Same subspace as the reference `grassmann_repr` (which returns (B, H*W, d)); we return
    its transpose, which in the common (C <= H*W) branch is a pure slice of Vh — so no
    HBM-materialized transpose feeds the Pallas matmul.
    Branch fixed per review: compare per-image matrix dims (C vs H*W), not batch vs C.
    """
    assert batch_imgs.ndim == 4
    b, c, h, w = batch_imgs.shape
    xs = batch_imgs.reshape(b, c, h * w)
    # TODO(synk): batched SVD has no Pallas equivalent; kept in plain JAX (XLA).
    U, S, Vh = jnp.linalg.svd(xs, full_matrices=False)
    if c > h * w:                                    # static-shape branch (per-image dims)
        return jnp.swapaxes(U[:, :, :dim_of_subspace], -1, -2)
    return Vh[:, :dim_of_subspace, :]                # (B, d, N): pure slice, no transpose


def init_prototypes(key, num_classes, num_of_protos, dim_of_data, dim_of_subspace):
    """Deterministic re-implementation of init_randn (forward-relevant parts).

    Returns prototypes in their native (P, N, d) layout AND a pre-flattened (N, P*d)
    copy (done ONCE here, since prototypes are static parameters) that the matmul
    kernel consumes directly with a constant index_map.
    """
    total = num_classes * num_of_protos
    g = jax.random.normal(key, (total, dim_of_data, dim_of_subspace), dtype=jnp.float32)
    Q, _ = jnp.linalg.qr(g, mode="reduced")                  # orthonormal prototypes (P, N, d)
    # W[n, p*d + j] = Q[p, n, j]
    w_flat = jnp.transpose(Q, (1, 0, 2)).reshape(dim_of_data, total * dim_of_subspace)
    relevances = jnp.ones((1, dim_of_subspace), jnp.float32) / dim_of_subspace
    return Q, w_flat, relevances


def grlgq_forward(xs, xprotos_flat, relevances, dim_of_subspace):
    """GRLGQ_Model.forward: returns (distance (B, P), Qw (B, P, d, d))."""
    d = dim_of_subspace
    xsub_t = grassmann_repr_t(xs, d)                         # (B, d, N)
    B, _, N = xsub_t.shape
    assert N == xprotos_flat.shape[0], "dim_of_data must equal H*W"
    PD = xprotos_flat.shape[1]
    P = PD // d
    assert P * d == PD

    # Hot path #1: one lane-dense MXU matmul (rows = B*d packed images, cols = P*d flattened
    # prototypes). Inputs kept f32 (arccos sensitivity near S ~= 1; bf16 would lose ~3 digits).
    xrows = xsub_t.reshape(B * d, N)                         # contiguous -> free reshape
    m_rows = cross_correlation_pallas(xrows, xprotos_flat)   # (B*d, P*d)
    # Cheap wrapper-side re-layout to the reference (B, P, d, d) order.
    M = m_rows.reshape(B, d, P, d).transpose(0, 2, 1, 3)     # (B, P, d, d)

    # TODO(synk): small d x d batched SVD has no Pallas equivalent; plain JAX.
    U, S, Vh = jnp.linalg.svd(M, full_matrices=False)        # S: (B, P, d)
    Qw = jnp.swapaxes(Vh, -1, -2)                            # (B, P, d, d)

    # Clamp guards against |S| > 1 from float rounding on products of orthonormal bases
    # (otherwise arccos -> NaN and the reference guard would fire).
    # TODO(synk): arccos kept in XLA glue (no reliable Mosaic lowering for acos).
    theta = jnp.arccos(jnp.clip(S, -1.0, 1.0))               # (B, P, d)

    # Hot path #2: relevance-weighted geodesic reduction (square fused, single grid step).
    distance = weighted_geodesic_distance_pallas(theta, relevances)  # (B, P)
    return distance, Qw


# ---------------------------------------------------------------------------
if __name__ == "__main__":
    key = jax.random.PRNGKey(0)
    k_x, k_p = jax.random.split(key)

    # Small shapes consistent with the module:
    #   B=2 images, C=4 channels, 4x4 spatial -> N = H*W = 16 = dim_of_data (img_size)
    #   num_classes=3, num_of_protos=2 per class -> P = 6 prototypes
    #   dim_of_subspace d = 3  (d <= min(C, N))
    B, C, H, W = 2, 4, 4, 4
    num_classes, num_of_protos, dim_of_subspace = 3, 2, 3
    img_size = H * W                                         # dim_of_data

    xs = jax.random.normal(k_x, (B, C, H, W), dtype=jnp.float32)
    xprotos, xprotos_flat, relevances = init_prototypes(
        k_p, num_classes, num_of_protos, img_size, dim_of_subspace
    )

    distance, Qw = grlgq_forward(xs, xprotos_flat, relevances, dim_of_subspace)
    distance, Qw = jax.block_until_ready((distance, Qw))

    # Mirror the reference NaN guard (clamping should keep it from ever firing).
    if bool(jnp.isnan(distance).any()):
        raise Exception("Error: NaN values!")

    P_total = num_classes * num_of_protos
    assert distance.shape == (B, P_total), distance.shape
    assert Qw.shape == (B, P_total, dim_of_subspace, dim_of_subspace), Qw.shape
    assert distance.dtype == jnp.float32

    print("KERNEL_OK")
</pallas_src>

<mosaic_0001>
module attributes {stable_mosaic.version = 11 : i64} {
  func.func @_xcorr_kernel(%arg0: i32, %arg1: memref<6x16xf32, #tpu.memory_space<vmem>>, %arg2: memref<16x18xf32, #tpu.memory_space<vmem>>, %arg3: memref<6x18xf32, #tpu.memory_space<vmem>>) attributes {dimension_semantics = [#tpu.dimension_semantics<parallel>], iteration_bounds = array<i64: 1>, scalar_prefetch = 0 : i64, scratch_operands = 0 : i64, tpu.core_type = #tpu.core_type<tc>, window_params = [{transform_indices = @transform_0, window_bounds = array<i64: 6, 16>}, {pipeline_mode = #tpu.pipeline_mode<synchronous>, transform_indices = @transform_1, window_bounds = array<i64: 16, 18>}, {transform_indices = @transform_2, window_bounds = array<i64: 6, 18>}]} {
    %c0 = arith.constant 0 : index
    %c0_0 = arith.constant 0 : index
    %0 = vector.load %arg1[%c0, %c0_0] : memref<6x16xf32, #tpu.memory_space<vmem>>, vector<6x16xf32>
    %c0_1 = arith.constant 0 : index
    %c0_2 = arith.constant 0 : index
    %1 = vector.load %arg2[%c0_1, %c0_2] : memref<16x18xf32, #tpu.memory_space<vmem>>, vector<16x18xf32>
    %cst = arith.constant dense<0.000000e+00> : vector<6x18xf32>
    %2 = tpu.matmul %0, %1, %cst {dimension_numbers = #tpu.dot_dimension_numbers<[1], [0], [0], [1], [0, 0, 1, 1], [], []>} : vector<6x16xf32>, vector<16x18xf32>, vector<6x18xf32> -> vector<6x18xf32>
    %c0_3 = arith.constant 0 : index
    %c0_4 = arith.constant 0 : index
    %3 = vector.load %arg3[%c0_3, %c0_4] : memref<6x18xf32, #tpu.memory_space<vmem>>, vector<6x18xf32>
    tpu.vector_store %arg3[%c0_3, %c0_4], %2 {strides = array<i32>} : memref<6x18xf32, #tpu.memory_space<vmem>>, vector<6x18xf32>,
    return
  }
  func.func @transform_0(%arg0: i32) -> (i32, i32) {
    %c0_i32 = arith.constant 0 : i32
    %c0_i32_0 = arith.constant 0 : i32
    return %arg0, %c0_i32 : i32, i32
  }
  func.func @transform_1(%arg0: i32) -> (i32, i32) {
    %c0_i32 = arith.constant 0 : i32
    %c0_i32_0 = arith.constant 0 : i32
    %c0_i32_1 = arith.constant 0 : i32
    return %c0_i32, %c0_i32_0 : i32, i32
  }
  func.func @transform_2(%arg0: i32) -> (i32, i32) {
    %c0_i32 = arith.constant 0 : i32
    %c0_i32_0 = arith.constant 0 : i32
    return %arg0, %c0_i32 : i32, i32
  }
}

</mosaic_0001>

<bundles_post_ra>
// kernel: tpu_custom_call.1
= control target key start
LH: loop header
LB: loop body
LE: loop exit
PB: predicated region body
PF: predicated region fallthrough
CT: control target
= control target key end

     0   :  { %7 = vsyncpa [#allocation3], 0  ;;  %s293_s0 = inlined_call_operand.hbm [shape: f32[6,16], index: 0, kind: input, shape index: {}]   ;;  %s294_s1 = inlined_call_operand.hbm [shape: f32[16,18], index: 1, kind: input, shape index: {}]   ;;  %s295_s2 = inlined_call_operand.hbm [shape: f32[6,18], index: 2, kind: output, shape index: {}]  }
   0x1   :  { %8 = vsyncpa [#allocation6], 0 }
   0x2   :  { %9 = vsyncpa [#allocation4], 0  ;;  %s227_s9 = smov [#allocation2]   ;;  %s228_s11 = smov [#allocation5]  }
   0x3   :  { %s16_s10 = sshll.u32 %s227_s9, 4  ;;  %s25_s12 = sshll.u32 %s228_s11, 4  ;;  %s17_s10 = int_to_ptr.vmem [resolvable:$true] %s16_s10  ;;  %s250_s12 = int_to_ptr.vmem [resolvable:$true] %s25_s12 }
   0x4   :  { %s155_s15 = scalar_lea.hbm %s293_s0, 128 }
   0x5   :  { %p156_p0 = scmp.ne.s32.totalorder %s293_s0, %s155_s15  ;;  %p159_p1 = scmp.lt.u32.totalorder %s155_s15, %s293_s0 }
   0x7   :  { %p161_p2 = pnand %p159_p1, %p156_p0 }
   0x9   :  { %164 = shalt.err (!%p161_p2)
}
   0xa   :  { %s165_s20 = scalar_lea.vmem %s17_s10, 128  ;;  %p170_p4 = scmp.lt.s32.totalorder %s17_s10, %s17_s10 }
   0xb   :  { %p166_p3 = scmp.ne.s32.totalorder %s17_s10, %s165_s20  ;;  %p171_p5 = scmp.lt.s32.totalorder %s165_s20, %s165_s20 }
   0xd   :  { %p172_p6 = por %p171_p5, %p170_p4 }
   0xf   :  { %p173_p7 = pnand %p172_p6, %p166_p3 }
  0x11   :  { %176 = shalt.err (!%p173_p7)
}
  0x12   :  { %19 = dma.hbm_to_vmem [thread:$0]  %s293_s0, 128, %s17_s10, [#allocation3]  }
  0x13   :  { %s177_s25 = scalar_lea.hbm %s294_s1, 256 }
  0x14   :  { %p178_p8 = scmp.ne.s32.totalorder %s294_s1, %s177_s25  ;;  %p181_p9 = scmp.lt.u32.totalorder %s177_s25, %s294_s1 }
  0x16   :  { %p183_p10 = pnand %p181_p9, %p178_p8 }
  0x18   :  { %186 = shalt.err (!%p183_p10)
}
  0x19   :  { %s187_s30 = scalar_lea.vmem %s250_s12, 256  ;;  %p192_p12 = scmp.lt.s32.totalorder %s250_s12, %s250_s12 }
  0x1a   :  { %p188_p11 = scmp.ne.s32.totalorder %s250_s12, %s187_s30  ;;  %p193_p13 = scmp.lt.s32.totalorder %s187_s30, %s187_s30 }
  0x1c   :  { %p194_p0 = por %p193_p13, %p192_p12 }
  0x1e   :  { %p195_p1 = pnand %p194_p0, %p188_p11 }
  0x20   :  { %198 = shalt.err (!%p195_p1)
}
  0x21   :  { %s229_s0 = smov 128   ;;  %s230_s3 = smov 8  }
  0x22   :  { %31 = dma.hbm_to_vmem [thread:$0]  %s294_s1, 256, %s250_s12, [#allocation6], %s229_s0, %s229_s0, %s230_s3  }
  0x23   :  { %221 = dma.done.wait [#allocation3], 128  }
  0x24   :  { %222 = vsyncadd [#allocation3], 4294967168 }
  0x25   :  { %223 = dma.done.wait [#allocation6], 256  }
  0x26   :  { %224 = vsyncadd [#allocation6], 4294967040  ;;  %v231_v0 = vmov 0.0|0.0   ;;  %vm232_vm0 = vmmov 0   ;;  %v233_v1 = vmov 0.0   ;;  %v39_v2 = vld [vmem:[#allocation5] sm:$0xff] }
  0x27   :  { %144 = vmatprep.subr.bf16.mxu0 %v231_v0  ;;  %141 = vmatprep.mubr.msk.f32.mxu0 %vm232_vm0, %v233_v1  ;;  %v40_v3 = vld [vmem:[#allocation5 + $0x8] sm:$0xff]  ;;  %v38_v5 = vld [vmem:[#allocation2] sm:$0x3f]  ;;  %vm41_vm1 = vcmask 130048   ;;  %s234_s6 = smov [#allocation7]   ;;  %vm115_vm2 = vcmask 144384  }
  0x28   :  { %v145_v4 = vpack.c.bf16 %v40_v3, %v39_v2  ;;  %s123_s7 = sshll.u32 %s234_s6, 4  ;;  %s124_s7 = int_to_ptr.vmem [resolvable:$true] %s123_s7 }
  0x29   :  { %s199_s1 = scalar_lea.vmem %s124_s7, 128  ;;  %p204_p3 = scmp.lt.s32.totalorder %s124_s7, %s124_s7 }
  0x2a   :  { %146 = vmatpush3.bf16.msra.mxu0 %v145_v4  ;;  %p200_p2 = scmp.ne.s32.totalorder %s124_s7, %s199_s1  ;;  %p205_p4 = scmp.lt.s32.totalorder %s199_s1, %s199_s1 }
  0x2c   :  { %p206_p5 = por %p205_p4, %p204_p3 }
  0x2d   :  { %142 = vmatmul.mubr.msk.f32.vlgmr.msra.gmra.mrb[0].mxu0 %vm41_vm1, %v38_v5 }
  0x2e   :  { %p207_p6 = pnand %p206_p5, %p200_p2 }
 0x100   :  { %v111_v6 = vpop.f32.mrb[0].mxu0 }
 0x101   :  { %v143_v7 = vpop.f32.mrb[1].mxu0  ;;  %116 = vst.msk [vmem:[#allocation7] sm:$0x3f] %vm115_vm2, %v111_v6 }
 0x102   :  { %210 = shalt.err (!%p207_p6)
}
 0x103   :  { %s211_s10 = scalar_lea.hbm %s295_s2, 128 }
 0x104   :  { %p212_p7 = scmp.ne.s32.totalorder %s295_s2, %s211_s10  ;;  %p215_p8 = scmp.lt.u32.totalorder %s211_s10, %s295_s2 }
 0x106   :  { %p217_p9 = pnand %p215_p8, %p212_p7 }
 0x108   :  { %220 = shalt.err (!%p217_p9)
}
 0x109   :  { %126 = dma.vmem_to_hbm [thread:$0]  %s124_s7, 128, %s295_s2, [#allocation4]  }
 0x10a   :  { %225 = dma.done.wait [#allocation4], 128  }
 0x10b   :  { %226 = vsyncadd [#allocation4], 4294967168 }
 0x10c   :  { %130 = vsyncpa [#allocation3], 1 }
 0x10d   :  { %131 = vsyncpa [#allocation6], 1 }
 0x10e   :  { %132 = vsyncpa [#allocation4], 1 }

</bundles_post_ra>
